<compile_context>
chip_gen: v6e
topology: v6e:2x2x1
jax: 0.10.0
libtpu: 0.0.40
codegen_flags: <defaults>
</compile_context>

<pallas_src>
import functools

import jax
import jax.numpy as jnp
import numpy as np
from jax.experimental import pallas as pl
from jax.experimental.pallas import tpu as pltpu


# ------------------------------ Pallas kernel ------------------------------

def cgcn_half_kernel(vis_ref, wf_ref, tb1_ref, adj_ref, w2_ref, out_ref, *,
                     normalize):
    """Fused C_GCN forward on one graph half (both halves are identical).

    vis_ref : (nc_p, dv_p)  l2-normalized visual embeddings        (mxu dtype)
    wf_ref  : (dv_p, d1_p)  fused weight  Wlin^T @ W1              (mxu dtype)
    tb1_ref : (nc_p, d1_p)  precomputed  text @ W1 + b_lin @ W1    (f32)
    adj_ref : (nc_p, nc_p)  gen_adj-normalized adjacency (half)    (mxu dtype)
    w2_ref  : (d1_p, tn)    gc2 weight column block                (mxu dtype)
    out_ref : (nc_p, tn)    concept features (one half; l2norm iff normalize)
    """
    mxu = w2_ref.dtype

    # gc1 front end; the visual nn.Linear is folded into (wf, tb1) at prep:
    #   sum over the two halves of concat([text, vis@Wlin^T + b]) @ W1
    #   == vis @ (Wlin^T @ W1) + (text @ W1 + b @ W1)
    s1 = jnp.dot(vis_ref[...], wf_ref[...],
                 preferred_element_type=jnp.float32) + tb1_ref[...]
    x1 = jnp.dot(adj_ref[...], s1.astype(mxu),
                 preferred_element_type=jnp.float32)

    # LeakyReLU(0.2): single VALU max (no compare+select).
    x1 = jnp.maximum(x1, 0.2 * x1)

    # gc2 with shared weights over adj_rep = tile(A,(2,2)): both halves of the
    # gc1 output are identical, hence the factor 2 on the half-graph result.
    s2 = jnp.dot(x1.astype(mxu), w2_ref[...],
                 preferred_element_type=jnp.float32)
    x2 = 2.0 * jnp.dot(adj_ref[...], s2.astype(mxu),
                       preferred_element_type=jnp.float32)

    if normalize:
        # l2norm with the module's eps placement: x / (sqrt(sum(x^2)) + eps).
        norm = jnp.sqrt(jnp.sum(x2 * x2, axis=-1, keepdims=True)) + 1e-12
        r = pl.reciprocal(norm, approx=True)      # EUP seed (~bf16-accurate)
        r = r * (2.0 - norm * r)                  # one Newton step -> ~f32
        x2 = x2 * r                               # zero-pad rows stay 0, no NaN

    out_ref[...] = x2.astype(out_ref.dtype)


# ------------------------------- wrappers -----------------------------------

def _round_up(x, m):
    return ((x + m - 1) // m) * m


def _pad2(x, target_shape):
    pads = [(0, t - s) for s, t in zip(x.shape, target_shape)]
    if not any(p[1] for p in pads):
        return x
    return jnp.pad(x, pads)


def prepare_cgcn_params(text_emb, wlin_t, blin, adj_norm, w1, w2, *,
                        mxu_dtype=jnp.bfloat16):
    """One-time constant preparation, hoisted out of the per-call forward.

    mxu_dtype=bfloat16 is valid on all generations (v5e/v6e/v7x) — the MXU is
    natively bf16 everywhere; all elementwise/l2norm math stays f32.
    adj_norm is the (nc, nc) gen_adj-normalized adjacency (NOT tiled); the
    kernel exploits adj_rep = tile(adj_norm, (2, 2)) algebraically.
    """
    nc = text_emb.shape[0]
    dv = wlin_t.shape[0]
    d1, d2 = w1.shape[1], w2.shape[1]

    itemsize = np.dtype(mxu_dtype).itemsize
    sub = 8 * (4 // itemsize)            # 8 sublanes for f32, 16 for bf16
    nc_p = _round_up(nc, sub)
    dv_p = _round_up(dv, 128)
    d1_p = _round_up(d1, 128)
    d2_p = _round_up(d2, 128)

    f32 = jnp.float32
    # Fold the visual nn.Linear into gc1 (constants, computed once in f32 so
    # text precision is preserved): s1 = vis @ (Wlin^T @ W1) + (text + b) @ W1
    wf = wlin_t.astype(f32) @ w1.astype(f32)                         # (dv, d1)
    tb1 = (text_emb.astype(f32) @ w1.astype(f32)
           + blin.astype(f32) @ w1.astype(f32))                      # (nc, d1)

    return dict(
        nc=nc, d2=d2, nc_p=nc_p, dv=dv, dv_p=dv_p, d1_p=d1_p, d2_p=d2_p,
        mxu_dtype=mxu_dtype,
        wf=_pad2(wf, (dv_p, d1_p)).astype(mxu_dtype),
        tb1=_pad2(tb1, (nc_p, d1_p)).astype(f32),
        adj=_pad2(adj_norm.astype(f32), (nc_p, nc_p)).astype(mxu_dtype),
        w2=_pad2(w2.astype(f32), (d1_p, d2_p)).astype(mxu_dtype),
    )


def c_gcn_forward(params, vis_emb_l2, *, col_tile=None, out_dtype=jnp.float32):
    """Fused C_GCN forward; only the visual embedding is prepped per call."""
    nc, nc_p = params["nc"], params["nc_p"]
    dv_p, d1_p = params["dv_p"], params["d1_p"]
    d2, d2_p = params["d2"], params["d2_p"]
    mxu = params["mxu_dtype"]

    # Per-call prep: pad/cast ONLY the visual embedding.
    vis_p = _pad2(vis_emb_l2, (nc_p, dv_p)).astype(mxu)

    # Column tiling of D2: engages v7x's 2nd TensorCore + pipelining at
    # production sizes; skipped at small sizes (per-step overhead dominates).
    if col_tile is None:
        col_tile = d2_p if d2_p <= 1024 else 512
    col_tile = min(col_tile, d2_p)
    assert col_tile % 128 == 0 and d2_p % col_tile == 0
    n_tiles = d2_p // col_tile

    inputs = (vis_p, params["wf"], params["tb1"], params["adj"], params["w2"])

    # Explicit VMEM budget (v7x: 64 MiB physical / 32 MiB scoped default).
    mxu_b = np.dtype(mxu).itemsize
    blk_bytes = (nc_p * dv_p * mxu_b + dv_p * d1_p * mxu_b +
                 nc_p * d1_p * 4 + nc_p * nc_p * mxu_b +
                 d1_p * col_tile * mxu_b + nc_p * col_tile * 4)
    vmem_limit = int(min(max(2 * blk_bytes + (2 << 20), 32 << 20), 96 << 20))

    if n_tiles == 1:
        vspec = pl.BlockSpec(memory_space=pltpu.MemorySpace.VMEM)
        out_p = pl.pallas_call(
            functools.partial(cgcn_half_kernel, normalize=True),
            out_shape=jax.ShapeDtypeStruct((nc_p, d2_p), out_dtype),
            in_specs=[vspec] * 5,
            out_specs=vspec,
            compiler_params=pltpu.CompilerParams(vmem_limit_bytes=vmem_limit),
        )(*inputs)
    else:
        out_p = pl.pallas_call(
            functools.partial(cgcn_half_kernel, normalize=False),
            out_shape=jax.ShapeDtypeStruct((nc_p, d2_p), jnp.float32),
            grid=(n_tiles,),
            in_specs=[
                pl.BlockSpec((nc_p, dv_p), lambda j: (0, 0)),
                pl.BlockSpec((dv_p, d1_p), lambda j: (0, 0)),
                pl.BlockSpec((nc_p, d1_p), lambda j: (0, 0)),
                pl.BlockSpec((nc_p, nc_p), lambda j: (0, 0)),
                pl.BlockSpec((d1_p, col_tile), lambda j: (0, j)),
            ],
            out_specs=pl.BlockSpec((nc_p, col_tile), lambda j: (0, j)),
            compiler_params=pltpu.CompilerParams(
                dimension_semantics=("parallel",),
                vmem_limit_bytes=vmem_limit),
        )(*inputs)
        # The l2norm needs full rows, so it runs here for the column-tiled
        # path (cheap mem-bound op relative to the matmuls at such sizes).
        norm = jnp.sqrt(jnp.sum(out_p * out_p, axis=-1, keepdims=True)) + 1e-12
        out_p = (out_p / norm).astype(out_dtype)

    half = out_p[:nc, :d2]
    # Both graph halves are identical (tile(A,(2,2)) + shared gc weights);
    # downstream code can consume `half` directly instead of the concat.
    return jnp.concatenate([half, half], axis=0)


# ---------------- glue: parameter setup (plain JAX / numpy) ----------------

def l2norm(x, axis=-1, eps=1e-12):
    norm = jnp.sqrt(jnp.sum(x * x, axis=axis, keepdims=True)) + eps
    return x / norm


def gen_adj(a):
    # Standard ML-GCN adjacency normalization: (A D^-1/2)^T D^-1/2
    d = jnp.power(jnp.sum(a, axis=1), -0.5)
    d = jnp.diag(d)
    return jnp.matmul(jnp.matmul(a, d).T, d)


def _reference_forward(text_emb, vis_emb_l2, wlin_t, blin, adj_norm, w1, w2):
    vis_lin = vis_emb_l2 @ wlin_t + blin
    init = jnp.concatenate([text_emb, vis_lin], axis=0)
    adj_rep = jnp.tile(adj_norm, (2, 2))
    x = adj_rep @ (init @ w1)
    x = jnp.where(x > 0, x, 0.2 * x)
    x = adj_rep @ (x @ w2)
    return l2norm(x, axis=-1)


def _make_gc_weights(key, in_channel, embed_size):
    # GraphConvolution init: uniform(-stdv, stdv), stdv = 1/sqrt(out_features)
    k1, k2 = jax.random.split(key)
    d1, d2 = embed_size // 2, embed_size
    stdv1 = 1.0 / np.sqrt(d1)
    stdv2 = 1.0 / np.sqrt(d2)
    w1 = jax.random.uniform(k1, (in_channel, d1), jnp.float32, -stdv1, stdv1)
    w2 = jax.random.uniform(k2, (d1, d2), jnp.float32, -stdv2, stdv2)
    return w1, w2


if __name__ == "__main__":
    # Small synthetic configuration
    num_classes = 8       # nc -> N = 2*nc = 16 graph nodes
    in_channel = 32       # text embedding dim (D0)
    vis_dim = 48          # visual embedding dim (Dv)
    embed_size = 64       # opt.embed_size -> gc1 out = 32 (D1), gc2 out = 64 (D2)

    key = jax.random.PRNGKey(0)
    k_text, k_vis, k_lin, k_gc, k_gc_big, k_adj = jax.random.split(key, 6)

    # Frozen embeddings (module l2-normalizes visual embeddings in __init__)
    text_emb = jax.random.normal(k_text, (num_classes, in_channel), jnp.float32)
    vis_emb = jax.random.normal(k_vis, (num_classes, vis_dim), jnp.float32)
    vis_emb_l2 = l2norm(vis_emb, axis=-1)

    # nn.Linear(vis_dim -> in_channel): Xavier-like uniform, bias zero
    r_ = np.sqrt(6.0) / np.sqrt(vis_dim + in_channel)
    wlin = jax.random.uniform(k_lin, (in_channel, vis_dim), jnp.float32, -r_, r_)
    wlin_t = wlin.T                                   # pass transposed: x @ W^T
    blin = jnp.zeros((1, in_channel), jnp.float32)

    w1, w2 = _make_gc_weights(k_gc, in_channel, embed_size)

    # TODO(synk): gen_A_concept / adj_file not provided; build a deterministic
    # synthetic symmetric adjacency and apply the standard gen_adj normalization.
    a = jax.random.uniform(k_adj, (num_classes, num_classes), jnp.float32)
    a = (a + a.T) * 0.5 + jnp.eye(num_classes, dtype=jnp.float32)
    adj_norm = gen_adj(a)                 # nc x nc; kernel exploits tile(2,2)

    ref = _reference_forward(text_emb, vis_emb_l2, wlin_t, blin, adj_norm, w1, w2)

    # --- f32 MXU path: tight check against the pure-JAX module reference ---
    params_f32 = prepare_cgcn_params(text_emb, wlin_t, blin, adj_norm, w1, w2,
                                     mxu_dtype=jnp.float32)
    fwd_f32 = jax.jit(lambda v: c_gcn_forward(params_f32, v))
    out_f32 = jax.block_until_ready(fwd_f32(vis_emb_l2))
    assert out_f32.shape == (2 * num_classes, embed_size)
    np.testing.assert_allclose(np.asarray(out_f32), np.asarray(ref),
                               rtol=2e-4, atol=2e-5)

    # --- bf16 MXU operand path (all generations incl. v5e): f32 accumulate ---
    params_bf16 = prepare_cgcn_params(text_emb, wlin_t, blin, adj_norm, w1, w2,
                                      mxu_dtype=jnp.bfloat16)
    fwd_bf16 = jax.jit(lambda v: c_gcn_forward(params_bf16, v))
    out_bf16 = jax.block_until_ready(fwd_bf16(vis_emb_l2))
    np.testing.assert_allclose(np.asarray(out_bf16), np.asarray(ref),
                               rtol=5e-2, atol=5e-2)

    # --- column-tiled "parallel" grid path (v7x), forced multi-tile here ---
    embed_big = 512       # D1 = 256, D2 = 512 -> 2 column tiles of 256
    w1b, w2b = _make_gc_weights(k_gc_big, in_channel, embed_big)
    ref_big = _reference_forward(text_emb, vis_emb_l2, wlin_t, blin, adj_norm,
                                 w1b, w2b)
    params_big = prepare_cgcn_params(text_emb, wlin_t, blin, adj_norm, w1b, w2b,
                                     mxu_dtype=jnp.float32)
    fwd_big = jax.jit(lambda v: c_gcn_forward(params_big, v, col_tile=256))
    out_big = jax.block_until_ready(fwd_big(vis_emb_l2))
    assert out_big.shape == (2 * num_classes, embed_big)
    np.testing.assert_allclose(np.asarray(out_big), np.asarray(ref_big),
                               rtol=5e-4, atol=5e-5)

    print("KERNEL_OK")
</pallas_src>

<mosaic_0001>
module attributes {stable_mosaic.version = 11 : i64} {
  func.func @cgcn_half_kernel(%arg0: memref<8x128xf32, #tpu.memory_space<vmem>>, %arg1: memref<128x128xf32, #tpu.memory_space<vmem>>, %arg2: memref<8x128xf32, #tpu.memory_space<vmem>>, %arg3: memref<8x8xf32, #tpu.memory_space<vmem>>, %arg4: memref<128x128xf32, #tpu.memory_space<vmem>>, %arg5: memref<8x128xf32, #tpu.memory_space<vmem>>) attributes {dimension_semantics = [], scalar_prefetch = 0 : i64, scratch_operands = 0 : i64, tpu.core_type = #tpu.core_type<tc>} {
    %c0 = arith.constant 0 : index
    %c0_0 = arith.constant 0 : index
    %0 = vector.load %arg0[%c0, %c0_0] : memref<8x128xf32, #tpu.memory_space<vmem>>, vector<8x128xf32>
    %c0_1 = arith.constant 0 : index
    %c0_2 = arith.constant 0 : index
    %1 = vector.load %arg1[%c0_1, %c0_2] : memref<128x128xf32, #tpu.memory_space<vmem>>, vector<128x128xf32>
    %cst = arith.constant dense<0.000000e+00> : vector<8x128xf32>
    %2 = tpu.matmul %0, %1, %cst {dimension_numbers = #tpu.dot_dimension_numbers<[1], [0], [0], [1], [0, 0, 1, 1], [], []>} : vector<8x128xf32>, vector<128x128xf32>, vector<8x128xf32> -> vector<8x128xf32>
    %c0_3 = arith.constant 0 : index
    %c0_4 = arith.constant 0 : index
    %3 = vector.load %arg2[%c0_3, %c0_4] : memref<8x128xf32, #tpu.memory_space<vmem>>, vector<8x128xf32>
    %4 = arith.addf %2, %3 : vector<8x128xf32>
    %c0_5 = arith.constant 0 : index
    %c0_6 = arith.constant 0 : index
    %5 = vector.load %arg3[%c0_5, %c0_6] : memref<8x8xf32, #tpu.memory_space<vmem>>, vector<8x8xf32>
    %cst_7 = arith.constant dense<0.000000e+00> : vector<8x128xf32>
    %6 = tpu.matmul %5, %4, %cst_7 {dimension_numbers = #tpu.dot_dimension_numbers<[1], [0], [0], [1], [0, 0, 1, 1], [], []>} : vector<8x8xf32>, vector<8x128xf32>, vector<8x128xf32> -> vector<8x128xf32>
    %cst_8 = arith.constant 2.000000e-01 : f32
    %7 = vector.broadcast %cst_8 : f32 to vector<8x128xf32>
    %8 = arith.mulf %7, %6 : vector<8x128xf32>
    %9 = arith.maximumf %6, %8 : vector<8x128xf32>
    %c0_9 = arith.constant 0 : index
    %c0_10 = arith.constant 0 : index
    %10 = vector.load %arg4[%c0_9, %c0_10] : memref<128x128xf32, #tpu.memory_space<vmem>>, vector<128x128xf32>
    %cst_11 = arith.constant dense<0.000000e+00> : vector<8x128xf32>
    %11 = tpu.matmul %9, %10, %cst_11 {dimension_numbers = #tpu.dot_dimension_numbers<[1], [0], [0], [1], [0, 0, 1, 1], [], []>} : vector<8x128xf32>, vector<128x128xf32>, vector<8x128xf32> -> vector<8x128xf32>
    %c0_12 = arith.constant 0 : index
    %c0_13 = arith.constant 0 : index
    %12 = vector.load %arg3[%c0_12, %c0_13] : memref<8x8xf32, #tpu.memory_space<vmem>>, vector<8x8xf32>
    %cst_14 = arith.constant dense<0.000000e+00> : vector<8x128xf32>
    %13 = tpu.matmul %12, %11, %cst_14 {dimension_numbers = #tpu.dot_dimension_numbers<[1], [0], [0], [1], [0, 0, 1, 1], [], []>} : vector<8x8xf32>, vector<8x128xf32>, vector<8x128xf32> -> vector<8x128xf32>
    %cst_15 = arith.constant 2.000000e+00 : f32
    %14 = vector.broadcast %cst_15 : f32 to vector<8x128xf32>
    %15 = arith.mulf %14, %13 : vector<8x128xf32>
    %16 = arith.mulf %15, %15 : vector<8x128xf32>
    %cst_16 = arith.constant dense<0.000000e+00> : vector<8xf32>
    %17 = vector.multi_reduction <add>, %16, %cst_16 [1] : vector<8x128xf32> to vector<8xf32>
    %18 = vector.shape_cast %17 : vector<8xf32> to vector<8x1xf32>
    %19 = math.sqrt %18 : vector<8x1xf32>
    %cst_17 = arith.constant 9.99999996E-13 : f32
    %20 = vector.broadcast %cst_17 : f32 to vector<8x1xf32>
    %21 = arith.addf %19, %20 : vector<8x1xf32>
    %22 = tpu.reciprocal %21 {approx = true} : vector<8x1xf32> -> vector<8x1xf32>
    %23 = arith.mulf %21, %22 : vector<8x1xf32>
    %cst_18 = arith.constant 2.000000e+00 : f32
    %24 = vector.broadcast %cst_18 : f32 to vector<8x1xf32>
    %25 = arith.subf %24, %23 : vector<8x1xf32>
    %26 = arith.mulf %22, %25 : vector<8x1xf32>
    %27 = vector.broadcast %26 : vector<8x1xf32> to vector<8x128xf32>
    %28 = arith.mulf %15, %27 : vector<8x128xf32>
    %c0_19 = arith.constant 0 : index
    %c0_20 = arith.constant 0 : index
    %29 = vector.load %arg5[%c0_19, %c0_20] : memref<8x128xf32, #tpu.memory_space<vmem>>, vector<8x128xf32>
    tpu.vector_store %arg5[%c0_19, %c0_20], %28 {strides = array<i32>} : memref<8x128xf32, #tpu.memory_space<vmem>>, vector<8x128xf32>,
    return
  }
}

</mosaic_0001>

<bundles_post_ra>
// kernel: _lambda_.1
= control target key start
LH: loop header
LB: loop body
LE: loop exit
PB: predicated region body
PF: predicated region fallthrough
CT: control target
= control target key end

     0   :  { %10 = vsyncpa [#allocation3], 0  ;;  %s665_s0 = inlined_call_operand.vmem [shape: f32[8,128], index: 0, kind: input, shape index: {}]   ;;  %s666_s1 = inlined_call_operand.hbm [shape: f32[128,128], index: 1, kind: input, shape index: {}]   ;;  %s667_s2 = inlined_call_operand.vmem [shape: f32[8,128], index: 2, kind: input, shape index: {}]   ;;  %s668_s3 = inlined_call_operand.vmem [shape: f32[8,8], index: 3, kind: input, shape index: {}]   ;;  %s669_s4 = inlined_call_operand.hbm [shape: f32[128,128], index: 4, kind: input, shape index: {}]   ;;  %s670_s5 = inlined_call_operand.vmem [shape: f32[8,128], index: 5, kind: output, shape index: {}]  }
   0x1   :  { %11 = vsyncpa [#allocation5], 0  ;;  %s567_s18 = smov [#allocation2]  }
   0x2   :  { %s19_s19 = sshll.u32 %s567_s18, 4  ;;  %s20_s19 = int_to_ptr.vmem [resolvable:$true] %s19_s19 }
   0x3   :  { %s531_s20 = scalar_lea.vmem %s20_s19, 2048  ;;  %p536_p1 = scmp.lt.s32.totalorder %s20_s19, %s20_s19 }
   0x4   :  { %p532_p0 = scmp.ne.s32.totalorder %s20_s19, %s531_s20  ;;  %p537_p2 = scmp.lt.s32.totalorder %s531_s20, %s531_s20 }
   0x6   :  { %p538_p3 = por %p537_p2, %p536_p1 }
   0x8   :  { %p539_p4 = pnand %p538_p3, %p532_p0 }
   0xa   :  { %542 = shalt.err (!%p539_p4)
}
   0xb   :  { %s568_s21 = smov 128   ;;  %s569_s22 = smov 8  }
   0xc   :  { %25 = dma.hbm_to_vmem [thread:$0]  %s666_s1, 2048, %s20_s19, [#allocation3], %s568_s21, %s568_s21, %s569_s22  }
   0xd   :  { %s570_s25 = smov [#allocation4]  }
   0xe   :  { %s35_s26 = sshll.u32 %s570_s25, 4  ;;  %s36_s26 = int_to_ptr.vmem [resolvable:$true] %s35_s26 }
   0xf   :  { %s551_s27 = scalar_lea.vmem %s36_s26, 2048  ;;  %p556_p6 = scmp.lt.s32.totalorder %s36_s26, %s36_s26 }
  0x10   :  { %p552_p5 = scmp.ne.s32.totalorder %s36_s26, %s551_s27  ;;  %p557_p7 = scmp.lt.s32.totalorder %s551_s27, %s551_s27 }
  0x12   :  { %p558_p8 = por %p557_p7, %p556_p6 }
  0x14   :  { %p559_p9 = pnand %p558_p8, %p552_p5 }
  0x16   :  { %562 = shalt.err (!%p559_p9)
}
  0x17   :  { %41 = dma.hbm_to_vmem [thread:$0]  %s669_s4, 2048, %s36_s26, [#allocation5], %s568_s21, %s568_s21, %s569_s22  }
  0x18   :  { %563 = dma.done.wait [#allocation3], 2048  }
  0x19   :  { %564 = vsyncadd [#allocation3], 4294965248 }
  0x1a   :  { %565 = dma.done.wait [#allocation5], 2048  }
  0x1b   :  { %566 = vsyncadd [#allocation5], 4294965248  ;;  %v571_v0 = vmov 0.0   ;;  %vm572_vm0 = vmmov 0   ;;  %v64_v1 = vld [vmem:[#allocation2 + $0x78] sm:$0xff]  ;;  %v63_v2 = vld [vmem:[#allocation2 + $0x70] sm:$0xff] }
  0x1c   :  { %433 = vmatprep.subr.mxu0 %v571_v0  ;;  %465 = vmatprep.mubr.msk.f32.mxu0 %vm572_vm0, %v571_v0  ;;  %v62_v3 = vld [vmem:[#allocation2 + $0x68] sm:$0xff]  ;;  %v61_v4 = vld [vmem:[#allocation2 + $0x60] sm:$0xff]  ;;  %v60_v5 = vld [vmem:[#allocation2 + $0x58] sm:$0xff]  ;;  %vm137_vm1 = vcmask 64512  }
  0x1d   :  { %468 = vmatprep.subr.mxu1 %v571_v0  ;;  %470 = vmatprep.mubr.msk.f32.mxu1 %vm572_vm0, %v571_v0  ;;  %v59_v6 = vld [vmem:[#allocation2 + $0x50] sm:$0xff]  ;;  %v58_v7 = vld [vmem:[#allocation2 + $0x48] sm:$0xff]  ;;  %v57_v8 = vld [vmem:[#allocation2 + $0x40] sm:$0xff] }
  0x1e   :  { %434 = vmatpush3.msra.mxu0 %v64_v1  ;;  %v56_v9 = vld [vmem:[#allocation2 + $0x38] sm:$0xff]  ;;  %v55_v10 = vld [vmem:[#allocation2 + $0x30] sm:$0xff]  ;;  %v54_v11 = vld [vmem:[#allocation2 + $0x28] sm:$0xff] }
  0x1f   :  { %435 = vmatprep.subr.mxu0 %v571_v0  ;;  %v53_v12 = vld [vmem:[#allocation2 + $0x20] sm:$0xff]  ;;  %v52_v13 = vld [vmem:[#allocation2 + $0x18] sm:$0xff]  ;;  %v51_v14 = vld [vmem:[#allocation2 + $0x10] sm:$0xff] }
  0x20   :  { %436 = vmatpush3.msra.mxu0 %v63_v2  ;;  %v50_v15 = vld [vmem:[#allocation2 + $0x8] sm:$0xff]  ;;  %v49_v16 = vld [vmem:[#allocation2] sm:$0xff]  ;;  %v228_v23 = vld [vmem:[#allocation4 + $0x78] sm:$0xff] }
  0x21   :  { %437 = vmatprep.subr.mxu0 %v571_v0  ;;  %v48_v17 = vld [vmem:[%s665_s0] sm:$0xff]  ;;  %v227_v24 = vld [vmem:[#allocation4 + $0x70] sm:$0xff]  ;;  %v226_v25 = vld [vmem:[#allocation4 + $0x68] sm:$0xff] }
  0x22   :  { %438 = vmatpush3.msra.mxu0 %v62_v3  ;;  %v65_v18 = vld [vmem:[%s667_s2] sm:$0xff]  ;;  %v224_v27 = vld [vmem:[#allocation4 + $0x58] sm:$0xff]  ;;  %v223_v28 = vld [vmem:[#allocation4 + $0x50] sm:$0xff] }
  0x23   :  { %439 = vmatprep.subr.mxu0 %v571_v0  ;;  %v136_v21 = vld [vmem:[%s668_s3] sm:$0xff]  ;;  %v222_v29 = vld [vmem:[#allocation4 + $0x48] sm:$0xff]  ;;  %v220_v31 = vld [vmem:[#allocation4 + $0x38] sm:$0xff] }
  0x24   :  { %440 = vmatpush3.msra.mxu0 %v61_v4  ;;  %v225_v26 = vld [vmem:[#allocation4 + $0x60] sm:$0xff]  ;;  %v219_v32 = vld [vmem:[#allocation4 + $0x30] sm:$0xff]  ;;  %v218_v33 = vld [vmem:[#allocation4 + $0x28] sm:$0xff] }
  0x25   :  { %441 = vmatprep.subr.mxu0 %v571_v0  ;;  %v221_v30 = vld [vmem:[#allocation4 + $0x40] sm:$0xff]  ;;  %v216_v35 = vld [vmem:[#allocation4 + $0x18] sm:$0xff]  ;;  %v215_v36 = vld [vmem:[#allocation4 + $0x10] sm:$0xff] }
  0x26   :  { %442 = vmatpush3.msra.mxu0 %v60_v5  ;;  %v217_v34 = vld [vmem:[#allocation4 + $0x20] sm:$0xff]  ;;  %v214_v37 = vld [vmem:[#allocation4 + $0x8] sm:$0xff] }
  0x27   :  { %443 = vmatprep.subr.mxu0 %v571_v0  ;;  %v213_v38 = vld [vmem:[#allocation4] sm:$0xff] }
  0x28   :  { %444 = vmatpush3.msra.mxu0 %v59_v6 }
  0x29   :  { %445 = vmatprep.subr.mxu0 %v571_v0 }
  0x2a   :  { %446 = vmatpush3.msra.mxu0 %v58_v7 }
  0x2b   :  { %447 = vmatprep.subr.mxu0 %v571_v0 }
  0x2c   :  { %448 = vmatpush3.msra.mxu0 %v57_v8 }
  0x2d   :  { %449 = vmatprep.subr.mxu0 %v571_v0 }
  0x2e   :  { %450 = vmatpush3.msra.mxu0 %v56_v9 }
  0x2f   :  { %451 = vmatprep.subr.mxu0 %v571_v0 }
  0x30   :  { %452 = vmatpush3.msra.mxu0 %v55_v10 }
  0x31   :  { %453 = vmatprep.subr.mxu0 %v571_v0 }
  0x32   :  { %454 = vmatpush3.msra.mxu0 %v54_v11 }
  0x33   :  { %455 = vmatprep.subr.mxu0 %v571_v0 }
  0x34   :  { %456 = vmatpush3.msra.mxu0 %v53_v12 }
  0x35   :  { %457 = vmatprep.subr.mxu0 %v571_v0 }
  0x36   :  { %458 = vmatpush3.msra.mxu0 %v52_v13 }
  0x37   :  { %459 = vmatprep.subr.mxu0 %v571_v0 }
  0x38   :  { %460 = vmatpush3.msra.mxu0 %v51_v14 }
  0x39   :  { %461 = vmatprep.subr.mxu0 %v571_v0 }
  0x3a   :  { %462 = vmatpush3.msra.mxu0 %v50_v15 }
  0x3b   :  { %463 = vmatprep.subr.mxu0 %v571_v0 }
  0x3c   :  { %464 = vmatpush3.msra.mxu0 %v49_v16 }
  0x3d   :  { %466 = vmatmul.mubr.f32.vlgmr.msra.gmra.mxu0 %v48_v17  ;;  %508 = vmatprep.subr.mxu0 %v571_v0 }
  0x3e   :  { %510 = vmatprep.mubr.msk.f32.mxu0 %vm572_vm0, %v571_v0 }
  0xfd   :  { %v132_v19 = vpop.f32.mrf.mxu0 }
  0xfe   :  { %v133_v20 = vadd.f32 %v132_v19, %v65_v18 }
  0xff   :  { %v467_v22 = vpop.f32.mrf.mxu0 }
 0x100   :  { %469 = vmatpush3.msra.mxu1 %v133_v20 }
 0x101   :  { %471 = vmatmul.mubr.msk.f32.vlgmr.msra.gmra.mxu1 %vm137_vm1, %v136_v21  ;;  %473 = vmatprep.subr.mxu1 %v571_v0 }
 0x102   :  { %474 = vmatpush3.msra.mxu1 %v228_v23  ;;  %505 = vmatprep.mubr.msk.f32.mxu1 %vm572_vm0, %v571_v0 }
 0x103   :  { %475 = vmatprep.subr.mxu1 %v571_v0 }
 0x104   :  { %476 = vmatpush3.msra.mxu1 %v227_v24 }
 0x105   :  { %477 = vmatprep.subr.mxu1 %v571_v0 }
 0x106   :  { %478 = vmatpush3.msra.mxu1 %v226_v25 }
 0x107   :  { %479 = vmatprep.subr.mxu1 %v571_v0 }
 0x108   :  { %480 = vmatpush3.msra.mxu1 %v225_v26 }
 0x109   :  { %481 = vmatprep.subr.mxu1 %v571_v0 }
 0x10a   :  { %482 = vmatpush3.msra.mxu1 %v224_v27 }
 0x10b   :  { %483 = vmatprep.subr.mxu1 %v571_v0 }
 0x10c   :  { %484 = vmatpush3.msra.mxu1 %v223_v28 }
 0x10d   :  { %485 = vmatprep.subr.mxu1 %v571_v0 }
 0x10e   :  { %486 = vmatpush3.msra.mxu1 %v222_v29 }
 0x10f   :  { %487 = vmatprep.subr.mxu1 %v571_v0 }
 0x110   :  { %488 = vmatpush3.msra.mxu1 %v221_v30 }
 0x111   :  { %489 = vmatprep.subr.mxu1 %v571_v0 }
 0x112   :  { %490 = vmatpush3.msra.mxu1 %v220_v31 }
 0x113   :  { %491 = vmatprep.subr.mxu1 %v571_v0 }
 0x114   :  { %492 = vmatpush3.msra.mxu1 %v219_v32 }
 0x115   :  { %493 = vmatprep.subr.mxu1 %v571_v0 }
 0x116   :  { %494 = vmatpush3.msra.mxu1 %v218_v33 }
 0x117   :  { %495 = vmatprep.subr.mxu1 %v571_v0 }
 0x118   :  { %496 = vmatpush3.msra.mxu1 %v217_v34 }
 0x119   :  { %497 = vmatprep.subr.mxu1 %v571_v0 }
 0x11a   :  { %498 = vmatpush3.msra.mxu1 %v216_v35 }
 0x11b   :  { %499 = vmatprep.subr.mxu1 %v571_v0 }
 0x11c   :  { %500 = vmatpush3.msra.mxu1 %v215_v36 }
 0x11d   :  { %501 = vmatprep.subr.mxu1 %v571_v0 }
 0x11e   :  { %502 = vmatpush3.msra.mxu1 %v214_v37 }
 0x11f   :  { %503 = vmatprep.subr.mxu1 %v571_v0 }
 0x120   :  { %504 = vmatpush3.msra.mxu1 %v213_v38 }
 0x1c1   :  { %v207_v39 = vpop.f32.mrf.mxu1 }
 0x1c2   :  { %v211_v40 = vmul.f32 0.2, %v207_v39 }
 0x1c3   :  { %v472_v41 = vpop.f32.mrf.mxu1 }
 0x1c4   :  { %v212_v42 = vmax.f32 %v207_v39, %v211_v40 }
 0x1c6   :  { %506 = vmatmul.mubr.f32.vlgmr.msra.gmra.mxu1 %v212_v42 }
 0x286   :  { %v295_v43 = vpop.f32.mrf.mxu1 }
 0x287   :  { %509 = vmatpush3.msra.mxu0 %v295_v43 }
 0x288   :  { %v507_v44 = vpop.f32.mrf.mxu1  ;;  %511 = vmatmul.mubr.msk.f32.vlgmr.msra.gmra.mxu0 %vm137_vm1, %v136_v21 }
 0x348   :  { %v365_v45 = vpop.f32.mrf.mxu0 }
 0x349   :  { %v369_v46 = vmul.f32 2.0, %v365_v45 }
 0x34a   :  { %v512_v47 = vpop.f32.mrf.mxu0 }
 0x34b   :  { %v370_v48 = vmul.f32 %v369_v46, %v369_v46 }
 0x34d   :  { %371 = vadd.xlane.f32.xlu0 %v370_v48 }
 0x3d6   :  { %v372_v49 = vpop.xlane.xlu0 %371 }
 0x3d7   :  { %519 = vrsqrt.f32 %v372_v49  ;;  %vm375_vm2 = vcmp.eq.f32.partialorder %v372_v49, inf  ;;  %v378_v52 = vand.u32 2147483648, %v372_v49  ;;  %vm377_vm3 = vcmp.eq.f32.partialorder %v372_v49, 0.0 }
 0x3e4   :  { %v520_v50 = vpop.eup %519 }
 0x3e5   :  { %v374_v51 = vmul.f32 %v520_v50, %v372_v49 }
 0x3e7   :  { %v376_v53 = vsel %vm375_vm2, %v372_v49, %v374_v51 }
 0x3e8   :  { %v379_v54 = vsel %vm377_vm3, %v378_v52, %v376_v53 }
 0x3e9   :  { %v380_v55 = vadd.f32 1e-12, %v379_v54 }
 0x3eb   :  { %521 = vrcp.f32 %v380_v55 }
 0x3f8   :  { %v522_v56 = vpop.eup %521 }
 0x3f9   :  { %v382_v57 = vmul.f32 %v522_v56, %v380_v55 }
 0x3fb   :  { %v383_v58 = vsub.f32 2.0, %v382_v57 }
 0x3fd   :  { %v384_v59 = vmul.f32 %v522_v56, %v383_v58 }
 0x3ff   :  { %v385_v60 = vmul.f32 %v384_v59, %v369_v46 }
 0x401   :  { %386 = vst [vmem:[%s670_s5] sm:$0xff] %v385_v60 }
 0x402   :  { %391 = vsyncpa [#allocation3], 1 }
 0x403   :  { %392 = vsyncpa [#allocation5], 1 }

</bundles_post_ra>
